<compile_context>
chip_gen: v6e
topology: v6e:2x2x1
jax: 0.10.0
libtpu: 0.0.40
codegen_flags: <defaults>
</compile_context>

<pallas_src>
import numpy as np
import jax
import jax.numpy as jnp
from jax import lax
from jax.experimental import pallas as pl
from jax.experimental.pallas import tpu as pltpu

NUM_CLASSES = 2
C_IN = 360                   # last_layer conv1 in_channels
C_MID = 180                  # last_layer conv1 out_channels
C_MID_PAD = 184              # padded to a sublane multiple (8), not 256
N_TAP = 9                    # 3x3 taps
G_CH = N_TAP * NUM_CLASSES   # packed (dy, dx, class) channels = 18


def _round_up(x, m):
    return (x + m - 1) // m * m


def _pick_pixel_tile(P, cap=2048):
    """Largest lane-friendly pixel tile: full P if small, else a multiple of
    128 that divides P; None if no such divisor exists (caller pads)."""
    if P <= cap:
        return P
    t = cap - cap % 128
    while t >= 128:
        if P % t == 0:
            return t
        t -= 128
    return None


def _pick_strip(ho, n, cap=256):
    """Output row-strip height: multiple of 8 dividing ho, ~cap rows, keeping
    the total grid step count even when n is small (v7x megacore balance)."""
    t = min(ho, cap)
    t -= t % 8
    while ho % t:
        t -= 8
    if (n * (ho // t)) % 2 == 1 and t % 16 == 0:
        t //= 2
    return t


# ----------------------------------------------------------------------------
# Kernel A: fused channel pipeline at backbone (low) resolution, channel-major.
# ----------------------------------------------------------------------------
def channel_kernel(x_ref, w1_ref, b1_ref, w2_ref, b2_ref, o_ref):
    # x_ref : (1, C_IN, tm)      f32, pixels on the lane axis
    # w1_ref: (C_MID_PAD, C_IN)  bf16  (transposed 1x1-conv weight, zero-pad rows)
    # b1_ref: (C_MID_PAD, 1)     f32
    # w2_ref: (G_CH, C_MID_PAD)  bf16  (packed 3x3-conv taps, zero-pad cols)
    # b2_ref: (G_CH, 1)          f32   (conv2 bias folded onto the centre tap)
    # o_ref : (1, G_CH, tm)      bf16
    x = x_ref[0].astype(jnp.bfloat16)
    y = jnp.dot(w1_ref[...], x, preferred_element_type=jnp.float32)
    y = jnp.maximum(y + b1_ref[...], 0.0)
    g = jnp.dot(w2_ref[...], y.astype(jnp.bfloat16),
                preferred_element_type=jnp.float32)
    o_ref[0] = (g + b2_ref[...]).astype(jnp.bfloat16)


def channel_pipeline(x3, w1, b1, w2, b2g):
    n, _, P = x3.shape
    tm = _pick_pixel_tile(P)
    Pp = P
    if tm is None:
        Pp = _round_up(P, 128)
        x3 = jnp.pad(x3, ((0, 0), (0, 0), (0, Pp - P)))
        tm = _pick_pixel_tile(Pp)
    out = pl.pallas_call(
        channel_kernel,
        out_shape=jax.ShapeDtypeStruct((n, G_CH, Pp), jnp.bfloat16),
        grid=(n, Pp // tm),
        in_specs=[
            pl.BlockSpec((1, C_IN, tm), lambda i, j: (i, 0, j)),
            pl.BlockSpec((C_MID_PAD, C_IN), lambda i, j: (0, 0)),
            pl.BlockSpec((C_MID_PAD, 1), lambda i, j: (0, 0)),
            pl.BlockSpec((G_CH, C_MID_PAD), lambda i, j: (0, 0)),
            pl.BlockSpec((G_CH, 1), lambda i, j: (0, 0)),
        ],
        out_specs=pl.BlockSpec((1, G_CH, tm), lambda i, j: (i, 0, j)),
        compiler_params=pltpu.CompilerParams(
            dimension_semantics=("parallel", "parallel")),
    )(x3, w1, b1, w2, b2g)
    return out if Pp == P else out[:, :, :P]


# ----------------------------------------------------------------------------
# Kernel T: per-image/class column expansion T = G_packed @ F_stack (hoisted
# out of the row-strip loop; 3 dx taps live on the contraction axis).
# ----------------------------------------------------------------------------
def tap_kernel(gb_ref, f_ref, t_ref):
    # gb_ref: (1, 1, 3h, 3w) bf16 ; f_ref: (3w, wo) bf16 ; t_ref: (1, 1, 3h, wo) bf16
    t = jnp.dot(gb_ref[0, 0], f_ref[...], preferred_element_type=jnp.float32)
    t_ref[0, 0] = t.astype(jnp.bfloat16)


def tap_pipeline(gb, f_mat):
    n, nc, h3, w3 = gb.shape
    wo = f_mat.shape[1]
    return pl.pallas_call(
        tap_kernel,
        out_shape=jax.ShapeDtypeStruct((n, nc, h3, wo), jnp.bfloat16),
        grid=(n, nc),
        in_specs=[
            pl.BlockSpec((1, 1, h3, w3), lambda i, c: (i, c, 0, 0)),
            pl.BlockSpec((w3, wo), lambda i, c: (0, 0)),
        ],
        out_specs=pl.BlockSpec((1, 1, h3, wo), lambda i, c: (i, c, 0, 0)),
        compiler_params=pltpu.CompilerParams(
            dimension_semantics=("parallel", "parallel")),
    )(gb, f_mat)


# ----------------------------------------------------------------------------
# Kernel B: row expansion out_strip[co] = E_strip @ T[co]  (3 dy taps on the
# contraction axis; single MXU dot per class per strip, lane-dense f32 store).
# ----------------------------------------------------------------------------
def expand_kernel(t_ref, e_ref, o_ref):
    # t_ref: (1, NUM_CLASSES, 3h, wo) bf16 ; e_ref: (th, 3h) bf16
    # o_ref: (1, NUM_CLASSES, th, wo) f32
    for co in range(NUM_CLASSES):
        o_ref[0, co] = jnp.dot(e_ref[...], t_ref[0, co],
                               preferred_element_type=jnp.float32)


def spatial_expand(t, e_mat, ho, wo):
    n, nc, h3, _ = t.shape
    th = _pick_strip(ho, n)
    s = ho // th
    return pl.pallas_call(
        expand_kernel,
        out_shape=jax.ShapeDtypeStruct((n, nc, ho, wo), jnp.float32),
        grid=(n, s),
        in_specs=[
            pl.BlockSpec((1, nc, h3, wo), lambda i, j: (i, 0, 0, 0)),
            pl.BlockSpec((th, h3), lambda i, j: (j, 0)),
        ],
        out_specs=pl.BlockSpec((1, nc, th, wo), lambda i, j: (i, 0, j, 0)),
        compiler_params=pltpu.CompilerParams(
            dimension_semantics=("parallel", "parallel")),
    )(t, e_mat)


def _make_expand_mats(h, w):
    """Exact 0/1 selection matrices (bf16) with the 3 taps stacked along the
    contraction axis.

    E[I, dy*h + p] = 1  iff low-res row p feeds (via up4, tap dy, pad=1, up2)
                     output row I; out-of-range (zero-pad) taps stay zero.
    F[dx*w + q, J] analogous for columns.
    """
    ho, wo = 8 * h, 8 * w
    e = np.zeros((ho, 3 * h), np.float32)
    f = np.zeros((3 * w, wo), np.float32)
    for d in range(3):
        r = np.arange(ho) // 2 + d - 1          # conv-input row on the up4 grid
        idx = np.nonzero((r >= 0) & (r < 4 * h))[0]
        e[idx, d * h + r[idx] // 4] = 1.0
        c = np.arange(wo) // 2 + d - 1
        idc = np.nonzero((c >= 0) & (c < 4 * w))[0]
        f[d * w + c[idc] // 4, idc] = 1.0
    return jnp.asarray(e, jnp.bfloat16), jnp.asarray(f, jnp.bfloat16)


# ----------------------------------------------------------------------------
# Full head forward (matches hrnet_w48_up8.forward after the backbone).
# ----------------------------------------------------------------------------
def hrnet_w48_up8_head_forward(x_nchw, params):
    n, c, h, w = x_nchw.shape
    assert c == C_IN
    ho, wo = 8 * h, 8 * w

    # Channel pipeline at backbone resolution, channel-major (no host
    # transpose/cast of the 360-channel input).
    g = channel_pipeline(x_nchw.reshape(n, C_IN, h * w),
                         params["w1"], params["b1"],
                         params["w2"], params["b2g"])          # (n, 18, h*w) bf16

    # Repack the tiny g tensor so the taps sit on contraction axes:
    # (n, dy, dx, co, p, q) -> (n, co, dy*h+p, dx*w+q).
    gb = jnp.transpose(g.reshape(n, 3, 3, NUM_CLASSES, h, w),
                       (0, 3, 1, 4, 2, 5)).reshape(n, NUM_CLASSES, 3 * h, 3 * w)

    e_mat, f_mat = _make_expand_mats(h, w)
    t = tap_pipeline(gb, f_mat)                 # (n, 2, 3h, 8w) bf16, once per image
    return spatial_expand(t, e_mat, ho, wo)     # (n, 2, 8h, 8w) f32


# ----------------------------------------------------------------------------
# Parameter prep (PyTorch layouts -> packed kernel layouts) + pure-JAX reference.
# ----------------------------------------------------------------------------
def init_params(key):
    k1, k2, k3, k4 = jax.random.split(key, 4)
    w1_t = jax.random.normal(k1, (C_MID, C_IN, 1, 1), jnp.float32) * 0.02
    b1_t = jax.random.normal(k2, (C_MID,), jnp.float32) * 0.02
    w2_t = jax.random.normal(k3, (NUM_CLASSES, C_MID, 3, 3), jnp.float32) * 0.02
    b2_t = jax.random.normal(k4, (NUM_CLASSES,), jnp.float32) * 0.02
    raw = {"w1": w1_t, "b1": b1_t, "w2": w2_t, "b2": b2_t}

    # Channel-major 1x1 conv weight: (C_MID_PAD, C_IN), zero-padded rows.
    w1 = jnp.zeros((C_MID_PAD, C_IN), jnp.float32).at[:C_MID, :].set(
        w1_t[:, :, 0, 0])
    b1 = jnp.zeros((C_MID_PAD, 1), jnp.float32).at[:C_MID, 0].set(b1_t)
    # (co, c, dy, dx) -> (dy, dx, co, c) -> (18, 180); row kc = (3*dy+dx)*2 + co.
    w2r = jnp.transpose(w2_t, (2, 3, 0, 1)).reshape(G_CH, C_MID)
    w2 = jnp.zeros((G_CH, C_MID_PAD), jnp.float32).at[:, :C_MID].set(w2r)
    # conv2 bias folded onto the centre tap (dy=dx=1 -> k=4): every output
    # pixel reads the centre tap at an in-range cell exactly once.
    b2g = jnp.zeros((G_CH, 1), jnp.float32)
    b2g = b2g.at[4 * NUM_CLASSES:5 * NUM_CLASSES, 0].set(b2_t)

    packed = {"w1": w1.astype(jnp.bfloat16), "b1": b1,
              "w2": w2.astype(jnp.bfloat16), "b2g": b2g}
    return packed, raw


def reference_forward(x, raw):
    y = jnp.einsum('nchw,dc->ndhw', x, raw["w1"][:, :, 0, 0])
    y = jnp.maximum(y + raw["b1"][None, :, None, None], 0.0)
    y = jnp.repeat(jnp.repeat(y, 4, axis=2), 4, axis=3)
    z = lax.conv_general_dilated(
        y, raw["w2"], window_strides=(1, 1), padding=((1, 1), (1, 1)),
        dimension_numbers=("NCHW", "OIHW", "NCHW"))
    z = z + raw["b2"][None, :, None, None]
    return jnp.repeat(jnp.repeat(z, 2, axis=2), 2, axis=3)


if __name__ == "__main__":
    key = jax.random.PRNGKey(0)
    pkey, xkey = jax.random.split(key)
    packed, raw = init_params(pkey)

    # Small synthetic backbone feature map: batch=2, 360 channels, 8x8 spatial.
    x = jax.random.normal(xkey, (2, C_IN, 8, 8), jnp.float32)

    out = jax.jit(hrnet_w48_up8_head_forward)(x, packed)
    out = jax.block_until_ready(out)

    assert out.shape == (2, NUM_CLASSES, 64, 64), out.shape
    assert out.dtype == jnp.float32

    ref = reference_forward(x, raw)
    err = float(jnp.max(jnp.abs(out - ref)))
    assert err < 0.1, f"max abs err vs f32 reference: {err}"
    print("KERNEL_OK")
</pallas_src>

<mosaic_0001>
module attributes {stable_mosaic.version = 11 : i64} {
  func.func @channel_kernel(%arg0: i32, %arg1: i32, %arg2: memref<1x360x64xf32, #tpu.memory_space<vmem>>, %arg3: memref<184x360xbf16, #tpu.memory_space<vmem>>, %arg4: memref<184x1xf32, #tpu.memory_space<vmem>>, %arg5: memref<18x184xbf16, #tpu.memory_space<vmem>>, %arg6: memref<18x1xf32, #tpu.memory_space<vmem>>, %arg7: memref<1x18x64xbf16, #tpu.memory_space<vmem>>) attributes {dimension_semantics = [#tpu.dimension_semantics<parallel>, #tpu.dimension_semantics<parallel>], iteration_bounds = array<i64: 2, 1>, scalar_prefetch = 0 : i64, scratch_operands = 0 : i64, tpu.core_type = #tpu.core_type<tc>, window_params = [{transform_indices = @transform_0, window_bounds = array<i64: 1, 360, 64>}, {pipeline_mode = #tpu.pipeline_mode<synchronous>, transform_indices = @transform_1, window_bounds = array<i64: 184, 360>}, {pipeline_mode = #tpu.pipeline_mode<synchronous>, transform_indices = @transform_2, window_bounds = array<i64: 184, 1>}, {pipeline_mode = #tpu.pipeline_mode<synchronous>, transform_indices = @transform_3, window_bounds = array<i64: 18, 184>}, {pipeline_mode = #tpu.pipeline_mode<synchronous>, transform_indices = @transform_4, window_bounds = array<i64: 18, 1>}, {transform_indices = @transform_5, window_bounds = array<i64: 1, 18, 64>}]} {
    %c0 = arith.constant 0 : index
    %c0_0 = arith.constant 0 : index
    %c0_1 = arith.constant 0 : index
    %0 = vector.load %arg2[%c0, %c0_0, %c0_1] : memref<1x360x64xf32, #tpu.memory_space<vmem>>, vector<1x360x64xf32>
    %1 = vector.shape_cast %0 : vector<1x360x64xf32> to vector<360x64xf32>
    %2 = arith.truncf %1 : vector<360x64xf32> to vector<360x64xbf16>
    %c0_2 = arith.constant 0 : index
    %c0_3 = arith.constant 0 : index
    %3 = vector.load %arg3[%c0_2, %c0_3] : memref<184x360xbf16, #tpu.memory_space<vmem>>, vector<184x360xbf16>
    %cst = arith.constant dense<0.000000e+00> : vector<184x64xf32>
    %4 = tpu.matmul %3, %2, %cst {dimension_numbers = #tpu.dot_dimension_numbers<[1], [0], [0], [1], [0, 0, 1, 1], [], []>} : vector<184x360xbf16>, vector<360x64xbf16>, vector<184x64xf32> -> vector<184x64xf32>
    %c0_4 = arith.constant 0 : index
    %c0_5 = arith.constant 0 : index
    %5 = vector.load %arg4[%c0_4, %c0_5] : memref<184x1xf32, #tpu.memory_space<vmem>>, vector<184x1xf32>
    %6 = vector.broadcast %5 : vector<184x1xf32> to vector<184x64xf32>
    %7 = arith.addf %4, %6 : vector<184x64xf32>
    %cst_6 = arith.constant 0.000000e+00 : f32
    %8 = vector.broadcast %cst_6 : f32 to vector<184x64xf32>
    %9 = arith.maximumf %7, %8 : vector<184x64xf32>
    %c0_7 = arith.constant 0 : index
    %c0_8 = arith.constant 0 : index
    %10 = vector.load %arg5[%c0_7, %c0_8] : memref<18x184xbf16, #tpu.memory_space<vmem>>, vector<18x184xbf16>
    %11 = arith.truncf %9 : vector<184x64xf32> to vector<184x64xbf16>
    %cst_9 = arith.constant dense<0.000000e+00> : vector<18x64xf32>
    %12 = tpu.matmul %10, %11, %cst_9 {dimension_numbers = #tpu.dot_dimension_numbers<[1], [0], [0], [1], [0, 0, 1, 1], [], []>} : vector<18x184xbf16>, vector<184x64xbf16>, vector<18x64xf32> -> vector<18x64xf32>
    %c0_10 = arith.constant 0 : index
    %c0_11 = arith.constant 0 : index
    %13 = vector.load %arg6[%c0_10, %c0_11] : memref<18x1xf32, #tpu.memory_space<vmem>>, vector<18x1xf32>
    %14 = vector.broadcast %13 : vector<18x1xf32> to vector<18x64xf32>
    %15 = arith.addf %12, %14 : vector<18x64xf32>
    %16 = arith.truncf %15 : vector<18x64xf32> to vector<18x64xbf16>
    %c0_12 = arith.constant 0 : index
    %c0_13 = arith.constant 0 : index
    %c0_14 = arith.constant 0 : index
    %17 = vector.load %arg7[%c0_12, %c0_13, %c0_14] : memref<1x18x64xbf16, #tpu.memory_space<vmem>>, vector<1x18x64xbf16>
    %18 = vector.shape_cast %17 : vector<1x18x64xbf16> to vector<18x64xbf16>
    %19 = vector.shape_cast %16 : vector<18x64xbf16> to vector<1x18x64xbf16>
    tpu.vector_store %arg7[%c0_12, %c0_13, %c0_14], %19 {strides = array<i32>} : memref<1x18x64xbf16, #tpu.memory_space<vmem>>, vector<1x18x64xbf16>,
    return
  }
  func.func @transform_0(%arg0: i32, %arg1: i32) -> (i32, i32, i32) {
    %c0_i32 = arith.constant 0 : i32
    %c0_i32_0 = arith.constant 0 : i32
    return %arg0, %c0_i32, %arg1 : i32, i32, i32
  }
  func.func @transform_1(%arg0: i32, %arg1: i32) -> (i32, i32) {
    %c0_i32 = arith.constant 0 : i32
    %c0_i32_0 = arith.constant 0 : i32
    %c0_i32_1 = arith.constant 0 : i32
    return %c0_i32, %c0_i32_0 : i32, i32
  }
  func.func @transform_2(%arg0: i32, %arg1: i32) -> (i32, i32) {
    %c0_i32 = arith.constant 0 : i32
    %c0_i32_0 = arith.constant 0 : i32
    %c0_i32_1 = arith.constant 0 : i32
    return %c0_i32, %c0_i32_0 : i32, i32
  }
  func.func @transform_3(%arg0: i32, %arg1: i32) -> (i32, i32) {
    %c0_i32 = arith.constant 0 : i32
    %c0_i32_0 = arith.constant 0 : i32
    %c0_i32_1 = arith.constant 0 : i32
    return %c0_i32, %c0_i32_0 : i32, i32
  }
  func.func @transform_4(%arg0: i32, %arg1: i32) -> (i32, i32) {
    %c0_i32 = arith.constant 0 : i32
    %c0_i32_0 = arith.constant 0 : i32
    %c0_i32_1 = arith.constant 0 : i32
    return %c0_i32, %c0_i32_0 : i32, i32
  }
  func.func @transform_5(%arg0: i32, %arg1: i32) -> (i32, i32, i32) {
    %c0_i32 = arith.constant 0 : i32
    %c0_i32_0 = arith.constant 0 : i32
    return %arg0, %c0_i32, %arg1 : i32, i32, i32
  }
}

module attributes {stable_mosaic.version = 11 : i64} {
  func.func @tap_kernel(%arg0: i32, %arg1: i32, %arg2: memref<1x1x24x24xbf16, #tpu.memory_space<vmem>>, %arg3: memref<24x64xbf16, #tpu.memory_space<vmem>>, %arg4: memref<1x1x24x64xbf16, #tpu.memory_space<vmem>>) attributes {dimension_semantics = [#tpu.dimension_semantics<parallel>, #tpu.dimension_semantics<parallel>], iteration_bounds = array<i64: 2, 2>, scalar_prefetch = 0 : i64, scratch_operands = 0 : i64, tpu.core_type = #tpu.core_type<tc>, window_params = [{transform_indices = @transform_0, window_bounds = array<i64: 1, 1, 24, 24>}, {pipeline_mode = #tpu.pipeline_mode<synchronous>, transform_indices = @transform_1, window_bounds = array<i64: 24, 64>}, {transform_indices = @transform_2, window_bounds = array<i64: 1, 1, 24, 64>}]} {
    %c0 = arith.constant 0 : index
    %c0_0 = arith.constant 0 : index
    %c0_1 = arith.constant 0 : index
    %c0_2 = arith.constant 0 : index
    %0 = vector.load %arg2[%c0, %c0_0, %c0_1, %c0_2] : memref<1x1x24x24xbf16, #tpu.memory_space<vmem>>, vector<1x1x24x24xbf16>
    %1 = vector.shape_cast %0 : vector<1x1x24x24xbf16> to vector<24x24xbf16>
    %c0_3 = arith.constant 0 : index
    %c0_4 = arith.constant 0 : index
    %2 = vector.load %arg3[%c0_3, %c0_4] : memref<24x64xbf16, #tpu.memory_space<vmem>>, vector<24x64xbf16>
    %cst = arith.constant dense<0.000000e+00> : vector<24x64xf32>
    %3 = tpu.matmul %1, %2, %cst {dimension_numbers = #tpu.dot_dimension_numbers<[1], [0], [0], [1], [0, 0, 1, 1], [], []>} : vector<24x24xbf16>, vector<24x64xbf16>, vector<24x64xf32> -> vector<24x64xf32>
    %4 = arith.truncf %3 : vector<24x64xf32> to vector<24x64xbf16>
    %c0_5 = arith.constant 0 : index
    %c0_6 = arith.constant 0 : index
    %c0_7 = arith.constant 0 : index
    %c0_8 = arith.constant 0 : index
    %5 = vector.load %arg4[%c0_5, %c0_6, %c0_7, %c0_8] : memref<1x1x24x64xbf16, #tpu.memory_space<vmem>>, vector<1x1x24x64xbf16>
    %6 = vector.shape_cast %5 : vector<1x1x24x64xbf16> to vector<24x64xbf16>
    %7 = vector.shape_cast %4 : vector<24x64xbf16> to vector<1x1x24x64xbf16>
    tpu.vector_store %arg4[%c0_5, %c0_6, %c0_7, %c0_8], %7 {strides = array<i32>} : memref<1x1x24x64xbf16, #tpu.memory_space<vmem>>, vector<1x1x24x64xbf16>,
    return
  }
  func.func @transform_0(%arg0: i32, %arg1: i32) -> (i32, i32, i32, i32) {
    %c0_i32 = arith.constant 0 : i32
    %c0_i32_0 = arith.constant 0 : i32
    %c0_i32_1 = arith.constant 0 : i32
    return %arg0, %arg1, %c0_i32, %c0_i32_0 : i32, i32, i32, i32
  }
  func.func @transform_1(%arg0: i32, %arg1: i32) -> (i32, i32) {
    %c0_i32 = arith.constant 0 : i32
    %c0_i32_0 = arith.constant 0 : i32
    %c0_i32_1 = arith.constant 0 : i32
    return %c0_i32, %c0_i32_0 : i32, i32
  }
  func.func @transform_2(%arg0: i32, %arg1: i32) -> (i32, i32, i32, i32) {
    %c0_i32 = arith.constant 0 : i32
    %c0_i32_0 = arith.constant 0 : i32
    %c0_i32_1 = arith.constant 0 : i32
    return %arg0, %arg1, %c0_i32, %c0_i32_0 : i32, i32, i32, i32
  }
}

module attributes {stable_mosaic.version = 11 : i64} {
  func.func @expand_kernel(%arg0: i32, %arg1: i32, %arg2: memref<1x2x24x64xbf16, #tpu.memory_space<vmem>>, %arg3: memref<64x24xbf16, #tpu.memory_space<vmem>>, %arg4: memref<1x2x64x64xf32, #tpu.memory_space<vmem>>) attributes {dimension_semantics = [#tpu.dimension_semantics<parallel>, #tpu.dimension_semantics<parallel>], iteration_bounds = array<i64: 2, 1>, scalar_prefetch = 0 : i64, scratch_operands = 0 : i64, tpu.core_type = #tpu.core_type<tc>, window_params = [{transform_indices = @transform_0, window_bounds = array<i64: 1, 2, 24, 64>}, {transform_indices = @transform_1, window_bounds = array<i64: 64, 24>}, {transform_indices = @transform_2, window_bounds = array<i64: 1, 2, 64, 64>}]} {
    %c0 = arith.constant 0 : index
    %c0_0 = arith.constant 0 : index
    %0 = vector.load %arg3[%c0, %c0_0] : memref<64x24xbf16, #tpu.memory_space<vmem>>, vector<64x24xbf16>
    %c0_1 = arith.constant 0 : index
    %c0_2 = arith.constant 0 : index
    %c0_3 = arith.constant 0 : index
    %c0_4 = arith.constant 0 : index
    %1 = vector.load %arg2[%c0_1, %c0_2, %c0_3, %c0_4] : memref<1x2x24x64xbf16, #tpu.memory_space<vmem>>, vector<1x1x24x64xbf16>
    %2 = vector.shape_cast %1 : vector<1x1x24x64xbf16> to vector<24x64xbf16>
    %cst = arith.constant dense<0.000000e+00> : vector<64x64xf32>
    %3 = tpu.matmul %0, %2, %cst {dimension_numbers = #tpu.dot_dimension_numbers<[1], [0], [0], [1], [0, 0, 1, 1], [], []>} : vector<64x24xbf16>, vector<24x64xbf16>, vector<64x64xf32> -> vector<64x64xf32>
    %c0_5 = arith.constant 0 : index
    %c0_6 = arith.constant 0 : index
    %c0_7 = arith.constant 0 : index
    %c0_8 = arith.constant 0 : index
    %4 = vector.load %arg4[%c0_5, %c0_6, %c0_7, %c0_8] : memref<1x2x64x64xf32, #tpu.memory_space<vmem>>, vector<1x1x64x64xf32>
    %5 = vector.shape_cast %4 : vector<1x1x64x64xf32> to vector<64x64xf32>
    %6 = vector.shape_cast %3 : vector<64x64xf32> to vector<1x1x64x64xf32>
    tpu.vector_store %arg4[%c0_5, %c0_6, %c0_7, %c0_8], %6 {strides = array<i32>} : memref<1x2x64x64xf32, #tpu.memory_space<vmem>>, vector<1x1x64x64xf32>,
    %c0_9 = arith.constant 0 : index
    %c0_10 = arith.constant 0 : index
    %7 = vector.load %arg3[%c0_9, %c0_10] : memref<64x24xbf16, #tpu.memory_space<vmem>>, vector<64x24xbf16>
    %c0_11 = arith.constant 0 : index
    %c1 = arith.constant 1 : index
    %c0_12 = arith.constant 0 : index
    %c0_13 = arith.constant 0 : index
    %8 = vector.load %arg2[%c0_11, %c1, %c0_12, %c0_13] : memref<1x2x24x64xbf16, #tpu.memory_space<vmem>>, vector<1x1x24x64xbf16>
    %9 = vector.shape_cast %8 : vector<1x1x24x64xbf16> to vector<24x64xbf16>
    %cst_14 = arith.constant dense<0.000000e+00> : vector<64x64xf32>
    %10 = tpu.matmul %7, %9, %cst_14 {dimension_numbers = #tpu.dot_dimension_numbers<[1], [0], [0], [1], [0, 0, 1, 1], [], []>} : vector<64x24xbf16>, vector<24x64xbf16>, vector<64x64xf32> -> vector<64x64xf32>
    %c0_15 = arith.constant 0 : index
    %c1_16 = arith.constant 1 : index
    %c0_17 = arith.constant 0 : index
    %c0_18 = arith.constant 0 : index
    %11 = vector.load %arg4[%c0_15, %c1_16, %c0_17, %c0_18] : memref<1x2x64x64xf32, #tpu.memory_space<vmem>>, vector<1x1x64x64xf32>
    %12 = vector.shape_cast %11 : vector<1x1x64x64xf32> to vector<64x64xf32>
    %13 = vector.shape_cast %10 : vector<64x64xf32> to vector<1x1x64x64xf32>
    tpu.vector_store %arg4[%c0_15, %c1_16, %c0_17, %c0_18], %13 {strides = array<i32>} : memref<1x2x64x64xf32, #tpu.memory_space<vmem>>, vector<1x1x64x64xf32>,
    return
  }
  func.func @transform_0(%arg0: i32, %arg1: i32) -> (i32, i32, i32, i32) {
    %c0_i32 = arith.constant 0 : i32
    %c0_i32_0 = arith.constant 0 : i32
    %c0_i32_1 = arith.constant 0 : i32
    %c0_i32_2 = arith.constant 0 : i32
    return %arg0, %c0_i32, %c0_i32_0, %c0_i32_1 : i32, i32, i32, i32
  }
  func.func @transform_1(%arg0: i32, %arg1: i32) -> (i32, i32) {
    %c0_i32 = arith.constant 0 : i32
    %c0_i32_0 = arith.constant 0 : i32
    return %arg1, %c0_i32 : i32, i32
  }
  func.func @transform_2(%arg0: i32, %arg1: i32) -> (i32, i32, i32, i32) {
    %c0_i32 = arith.constant 0 : i32
    %c0_i32_0 = arith.constant 0 : i32
    %c0_i32_1 = arith.constant 0 : i32
    return %arg0, %c0_i32, %arg1, %c0_i32_0 : i32, i32, i32, i32
  }
}

</mosaic_0001>

<bundles_post_ra>
// kernel: hrnet_w48_up8_head_forward.3
= control target key start
LH: loop header
LB: loop body
LE: loop exit
PB: predicated region body
PF: predicated region fallthrough
CT: control target
= control target key end

     0   :  { %s1562_s18 = smov 0   ;;  %s1564_s19 = smov 0   ;;  %s1953_s0 = inlined_call_operand.vmem [shape: f32[2,360,64], index: 0, kind: input, shape index: {}]   ;;  %s1954_s1 = inlined_call_operand.vmem [shape: bf16[184,360], index: 1, kind: input, shape index: {}]   ;;  %s1955_s2 = inlined_call_operand.vmem [shape: f32[184,1], index: 2, kind: input, shape index: {}]   ;;  %s1956_s3 = inlined_call_operand.vmem [shape: bf16[18,184], index: 3, kind: input, shape index: {}]   ;;  %s1957_s4 = inlined_call_operand.vmem [shape: f32[18,1], index: 4, kind: input, shape index: {}]   ;;  %s1958_s5 = inlined_call_operand.vmem [shape: bf16[2,18,64], index: 5, kind: output, shape index: {}]  }
   0x1   :  { %s1566_s20 = smov 0  }
   0x2 LB: > { %s27_s21 = sadd.s32 1, %s1525_s19  ;;  %p1215_p0 = scmp.ge.s32.totalorder %s1529_s20, 1  ;;  %s1529_s20 = sphi %s1566_s20, %s15_s20   ;;  %s1525_s19 = sphi %s1564_s19, %s1960_s19   ;;  %s1521_s18 = sphi %s1562_s18, %s1959_s18  }
   0x3   : > { %p29_p1 = scmp.ge.s32.totalorder %s27_s21, 2  ;;  %p206_p2 = scmp.lt.s32.totalorder %s1529_s20, 3 }
   0x5   : > { %s1962_s21 = smov (%p29_p1, %s27_s21), 0  ;;  %p207_p3 = pnand %p1215_p0, %p206_p2 }
   0x6   : > { %p240_p4 = scmp.lt.s32.totalorder (!%p207_p3), %s1521_s18, 1 }
   0x7   : > { %210 = sbr.rel (%p207_p3) target bundleno = 570 (0x23a), region = 40 }
   0xc   : > { %v1457_v0 = vld [vmem:[%s1954_s1 + $0x4] ss:$12 sps:$4 sm:$0xff]   ;;  %s1964_s18 = smov (!%p240_p4, %s1521_s18), 1  ;;  %v1458_v1 = vld [vmem:[%s1954_s1 + $0x8] ss:$12 sps:$4 sm:$0xff]   ;;  %vm684_vm0 = vcmask 850944  }
   0xd   : > { %757 = vmatprep.mubr.bf16.mxu0 %v1457_v0  ;;  %s1426_s26 = smul.u32 360, %s1964_s18  ;;  %1401 = vmatprep.mubr.msk.bf16.mxu1 %vm684_vm0, %v1458_v1  ;;  %v1531_v2 = vmov 0   ;;  %vm721_vm1 = vcmask 1043456   ;;  %vm1052_vm2 = vcmask 457728   ;;  %vm1123_vm3 = vcmask 519168  }
   0xe   : > { %1453 = vset.pattern.permute.xlu0 %v1531_v2  ;;  %1454 = vset.pattern.permute.xlu1 %v1531_v2  ;;  %s1427_s28 = smul.u32 12, %s1964_s18  ;;  %vm1126_vm4 = vcmask 516096  }
   0xf   : > { %s1595_s29 = scalar_lea.vmem %s1953_s0, %s1426_s26 }
  0x10   : > { %v287_v3 = vld [vmem:[%s1595_s29 + $0xf0] sm:$0xff]  ;;  %v288_v4 = vld [vmem:[%s1595_s29 + $0xf8] sm:$0xff]  ;;  %v285_v8 = vld [vmem:[%s1595_s29 + $0xe0] sm:$0xff]  ;;  %s255_s6 = scalar_lea.vmem %s1958_s5, %s1427_s28 }
  0x11   : > { %v271_v5 = vld [vmem:[%s1595_s29 + $0x70] sm:$0xff]  ;;  %v317_v6 = vpack.c.bf16 %v288_v4, %v287_v3  ;;  %v272_v7 = vld [vmem:[%s1595_s29 + $0x78] sm:$0xff]  ;;  %v286_v9 = vld [vmem:[%s1595_s29 + $0xe8] sm:$0xff] }
  0x12   : > { %v309_v10 = vpack.c.bf16 %v272_v7, %v271_v5  ;;  %v316_v11 = vpack.c.bf16 %v286_v9, %v285_v8  ;;  %v269_v12 = vld [vmem:[%s1595_s29 + $0x60] sm:$0xff]  ;;  %v270_v13 = vld [vmem:[%s1595_s29 + $0x68] sm:$0xff]  ;;  %v283_v14 = vld [vmem:[%s1595_s29 + $0xd0] sm:$0xff] }
  0x13   : > { %1280 = vmatprep.subr.bf16.mxu0 %v317_v6  ;;  %v284_v15 = vld [vmem:[%s1595_s29 + $0xd8] sm:$0xff]  ;;  %v301_v16 = vld [vmem:[%s1595_s29 + $0x160] sm:$0xff]  ;;  %v308_v17 = vpack.c.bf16 %v270_v13, %v269_v12  ;;  %v267_v19 = vld [vmem:[%s1595_s29 + $0x50] sm:$0xff] }
  0x14   : > { %1281 = vmatpush3.bf16.msra.mxu0 %v309_v10  ;;  %v324_v18 = vpack.c.bf16 %v301_v16, %v301_v16  ;;  %v315_v20 = vpack.c.bf16 %v284_v15, %v283_v14  ;;  %v268_v21 = vld [vmem:[%s1595_s29 + $0x58] sm:$0xff]  ;;  %v299_v22 = vld [vmem:[%s1595_s29 + $0x150] sm:$0xff]  ;;  %v281_v25 = vld [vmem:[%s1595_s29 + $0xc0] sm:$0xff] }
  0x15   : > { %1282 = vmatprep.subr.bf16.mxu0 %v316_v11  ;;  %v300_v23 = vld [vmem:[%s1595_s29 + $0x158] sm:$0xff]  ;;  %v282_v26 = vld [vmem:[%s1595_s29 + $0xc8] sm:$0xff]  ;;  %v297_v28 = vld [vmem:[%s1595_s29 + $0x140] sm:$0xff]  ;;  %v307_v30 = vpack.c.bf16 %v268_v21, %v267_v19 }
  0x16   : > { %1425 = vmatprep.subr.msk.bf16.mxu1 %vm721_vm1, %v324_v18  ;;  %v723_v24 = vsel %vm721_vm1, %v324_v18, 0  ;;  %v323_v27 = vpack.c.bf16 %v300_v23, %v299_v22  ;;  %v298_v29 = vld [vmem:[%s1595_s29 + $0x148] sm:$0xff]  ;;  %v265_v31 = vld [vmem:[%s1595_s29 + $0x40] sm:$0xff]  ;;  %v314_v33 = vpack.c.bf16 %v282_v26, %v281_v25  ;;  %v295_v35 = vld [vmem:[%s1595_s29 + $0x130] sm:$0xff] }
  0x17   : > { %1388 = vmatpush3.bf16.msra.mxu1 %v723_v24  ;;  %v322_v32 = vpack.c.bf16 %v298_v29, %v297_v28  ;;  %v266_v34 = vld [vmem:[%s1595_s29 + $0x48] sm:$0xff]  ;;  %v296_v36 = vld [vmem:[%s1595_s29 + $0x138] sm:$0xff]  ;;  %v279_v37 = vld [vmem:[%s1595_s29 + $0xb0] sm:$0xff] }
  0x18   : > { %1283 = vmatpush3.bf16.msra.mxu0 %v308_v17  ;;  %1389 = vmatprep.subr.bf16.mxu1 %v323_v27  ;;  %v280_v38 = vld [vmem:[%s1595_s29 + $0xb8] sm:$0xff]  ;;  %v306_v39 = vpack.c.bf16 %v266_v34, %v265_v31  ;;  %v263_v40 = vld [vmem:[%s1595_s29 + $0x30] sm:$0xff]  ;;  %v321_v41 = vpack.c.bf16 %v296_v36, %v295_v35  ;;  %v293_v44 = vld [vmem:[%s1595_s29 + $0x120] sm:$0xff] }
  0x19   : > { %1284 = vmatprep.subr.bf16.mxu0 %v315_v20  ;;  %v313_v42 = vpack.c.bf16 %v280_v38, %v279_v37  ;;  %v264_v43 = vld [vmem:[%s1595_s29 + $0x38] sm:$0xff]  ;;  %v294_v45 = vld [vmem:[%s1595_s29 + $0x128] sm:$0xff]  ;;  %v277_v46 = vld [vmem:[%s1595_s29 + $0xa0] sm:$0xff] }
  0x1a   : > { %v278_v47 = vld [vmem:[%s1595_s29 + $0xa8] sm:$0xff]  ;;  %v261_v48 = vld [vmem:[%s1595_s29 + $0x20] sm:$0xff]  ;;  %v305_v49 = vpack.c.bf16 %v264_v43, %v263_v40  ;;  %v320_v51 = vpack.c.bf16 %v294_v45, %v293_v44  ;;  %v291_v53 = vld [vmem:[%s1595_s29 + $0x110] sm:$0xff] }
  0x1b   : > { %1390 = vmatpush3.bf16.msra.mxu1 %v323_v27  ;;  %v262_v50 = vld [vmem:[%s1595_s29 + $0x28] sm:$0xff]  ;;  %v312_v52 = vpack.c.bf16 %v278_v47, %v277_v46  ;;  %v292_v54 = vld [vmem:[%s1595_s29 + $0x118] sm:$0xff]  ;;  %v275_v55 = vld [vmem:[%s1595_s29 + $0x90] sm:$0xff] }
  0x1c   : > { %1285 = vmatpush3.bf16.msra.mxu0 %v307_v30  ;;  %1391 = vmatprep.subr.bf16.mxu1 %v322_v32  ;;  %v276_v56 = vld [vmem:[%s1595_s29 + $0x98] sm:$0xff]  ;;  %v259_v57 = vld [vmem:[%s1595_s29 + $0x10] sm:$0xff]  ;;  %v304_v59 = vpack.c.bf16 %v262_v50, %v261_v48  ;;  %v273_v60 = vld [vmem:[%s1595_s29 + $0x80] sm:$0xff]  ;;  %v319_v61 = vpack.c.bf16 %v292_v54, %v291_v53 }
  0x1d   : > { %1286 = vmatprep.subr.bf16.mxu0 %v314_v33  ;;  %v260_v58 = vld [vmem:[%s1595_s29 + $0x18] sm:$0xff]  ;;  %v289_v62 = vld [vmem:[%s1595_s29 + $0x100] sm:$0xff]  ;;  %v311_v63 = vpack.c.bf16 %v276_v56, %v275_v55  ;;  %v290_v0 = vld [vmem:[%s1595_s29 + $0x108] sm:$0xff] }
  0x1e   : > { %v274_v1 = vld [vmem:[%s1595_s29 + $0x88] sm:$0xff]  ;;  %v385_v3 = vld [vmem:[%s1955_s2 + $0x70] sm:$0xff]  ;;  %v257_v4 = vld [vmem:[%s1595_s29] sm:$0xff]  ;;  %v303_v5 = vpack.c.bf16 %v260_v58, %v259_v57  ;;  %v318_v6 = vpack.c.bf16 %v290_v0, %v289_v62 }
  0x1f   : > { %1392 = vmatpush3.bf16.msra.mxu1 %v322_v32  ;;  %466 = vperm.xlu0 %1453, %v385_v3   ;;  %v386_v7 = vld [vmem:[%s1955_s2 + $0x78] sm:$0xff]  ;;  %v383_v8 = vld [vmem:[%s1955_s2 + $0x60] sm:$0xff]  ;;  %v310_v9 = vpack.c.bf16 %v274_v1, %v273_v60  ;;  %v258_v10 = vld [vmem:[%s1595_s29 + $0x8] sm:$0xff] }
  0x20   : > { %1287 = vmatpush3.bf16.msra.mxu0 %v306_v39  ;;  %1393 = vmatprep.subr.bf16.mxu1 %v321_v41  ;;  %v384_v11 = vld [vmem:[%s1955_s2 + $0x68] sm:$0xff]  ;;  %v302_v12 = vpack.c.bf16 %v258_v10, %v257_v4  ;;  %v381_v13 = vld [vmem:[%s1955_s2 + $0x50] sm:$0xff]  ;;  %v382_v15 = vld [vmem:[%s1955_s2 + $0x58] sm:$0xff] }
  0x21   : > { %1288 = vmatprep.subr.bf16.mxu0 %v313_v42  ;;  %456 = vperm.xlu1 %1454, %v383_v8   ;;  %v1459_v14 = vld [vmem:[%s1954_s1 + $0x20] ss:$12 sps:$4 sm:$0xff]   ;;  %v1466_v17 = vld [vmem:[%s1954_s1 + $0x38] ss:$12 sps:$4 sm:$0xff]   ;;  %v1460_v18 = vld [vmem:[%s1954_s1 + $0x1c] ss:$12 sps:$4 sm:$0xff]  }
  0x22   : > { %v1455_v16 = vld [vmem:[%s1954_s1] ss:$12 sps:$4 sm:$0xff]   ;;  %v1467_v21 = vld [vmem:[%s1954_s1 + $0x50] ss:$12 sps:$4 sm:$0xff]   ;;  %v1462_v24 = vld [vmem:[%s1954_s1 + $0x18] ss:$12 sps:$4 sm:$0xff]  }
  0x23   : > { %1394 = vmatpush3.bf16.msra.mxu1 %v321_v41  ;;  %471 = vperm.xlu0 %1453, %v386_v7   ;;  %v379_v19 = vld [vmem:[%s1955_s2 + $0x40] sm:$0xff]  ;;  %v380_v20 = vld [vmem:[%s1955_s2 + $0x48] sm:$0xff]  ;;  %v377_v22 = vld [vmem:[%s1955_s2 + $0x30] sm:$0xff] }
  0x24   : > { %1289 = vmatpush3.bf16.msra.mxu0 %v305_v49  ;;  %1395 = vmatprep.subr.bf16.mxu1 %v320_v51  ;;  %v378_v23 = vld [vmem:[%s1955_s2 + $0x38] sm:$0xff]  ;;  %v1474_v25 = vld [vmem:[%s1954_s1 + $0x68] ss:$12 sps:$4 sm:$0xff]   ;;  %v375_v27 = vld [vmem:[%s1955_s2 + $0x20] sm:$0xff] }
  0x25   : > { %1290 = vmatprep.subr.bf16.mxu0 %v312_v52  ;;  %461 = vperm.xlu1 %1454, %v384_v11   ;;  %v1463_v26 = vld [vmem:[%s1954_s1 + $0x34] ss:$12 sps:$4 sm:$0xff]   ;;  %v376_v28 = vld [vmem:[%s1955_s2 + $0x28] sm:$0xff]  ;;  %v374_v31 = vld [vmem:[%s1955_s2 + $0x18] sm:$0xff] }
  0x26   : > { %v373_v29 = vld [vmem:[%s1955_s2 + $0x10] sm:$0xff]  ;;  %v1475_v30 = vld [vmem:[%s1954_s1 + $0x80] ss:$12 sps:$4 sm:$0xff]   ;;  %v1482_v33 = vld [vmem:[%s1954_s1 + $0x98] ss:$12 sps:$4 sm:$0xff]  }
  0x27   : > { %1396 = vmatpush3.bf16.msra.mxu1 %v320_v51  ;;  %446 = vperm.xlu0 %1453, %v381_v13   ;;  %v1465_v32 = vld [vmem:[%s1954_s1 + $0x30] ss:$12 sps:$4 sm:$0xff]   ;;  %v1468_v34 = vld [vmem:[%s1954_s1 + $0x4c] ss:$12 sps:$4 sm:$0xff]   ;;  %v371_v35 = vld [vmem:[%s1955_s2] sm:$0xff] }
  0x28   : > { %1291 = vmatpush3.bf16.msra.mxu0 %v304_v59  ;;  %1397 = vmatprep.subr.bf16.mxu1 %v319_v61  ;;  %v372_v36 = vld [vmem:[%s1955_s2 + $0x8] sm:$0xff]  ;;  %v393_v37 = vld [vmem:[%s1955_s2 + $0xb0] sm:$0xff]  ;;  %v391_v39 = vld [vmem:[%s1955_s2 + $0xa0] sm:$0xff] }
  0x29   : > { %1292 = vmatprep.subr.bf16.mxu0 %v311_v63  ;;  %451 = vperm.xlu1 %1454, %v382_v15   ;;  %v1483_v38 = vld [vmem:[%s1954_s1 + $0xb0] ss:$12 sps:$4 sm:$0xff]   ;;  %v1470_v40 = vld [vmem:[%s1954_s1 + $0x48] ss:$12 sps:$4 sm:$0xff]   ;;  %v1491_v46 = vld [vmem:[%s1954_s1 + $0xe0] ss:$12 sps:$4 sm:$0xff]  }
  0x2a   : > { %v1490_v41 = vld [vmem:[%s1954_s1 + $0xc8] ss:$12 sps:$4 sm:$0xff]   ;;  %v1471_v42 = vld [vmem:[%s1954_s1 + $0x64] ss:$12 sps:$4 sm:$0xff]   ;;  %v390_v45 = vld [vmem:[%s1955_s2 + $0x98] sm:$0xff] }
  0x2b   : > { %1398 = vmatpush3.bf16.msra.mxu1 %v319_v61  ;;  %436 = vperm.xlu0 %1453, %v379_v19   ;;  %v392_v43 = vld [vmem:[%s1955_s2 + $0xa8] sm:$0xff]  ;;  %v389_v44 = vld [vmem:[%s1955_s2 + $0x90] sm:$0xff]  ;;  %v387_v47 = vld [vmem:[%s1955_s2 + $0x80] sm:$0xff] }
  0x2c   : > { %1293 = vmatpush3.bf16.msra.mxu0 %v303_v5  ;;  %1399 = vmatprep.subr.bf16.mxu1 %v318_v6  ;;  %v1473_v48 = vld [vmem:[%s1954_s1 + $0x60] ss:$12 sps:$4 sm:$0xff]   ;;  %v1498_v49 = vld [vmem:[%s1954_s1 + $0xf8] ss:$12 sps:$4 sm:$0xff]   ;;  %v1476_v50 = vld [vmem:[%s1954_s1 + $0x7c] ss:$12 sps:$4 sm:$0xff]  }
  0x2d   : > { %1294 = vmatprep.subr.bf16.mxu0 %v310_v9  ;;  %441 = vperm.xlu1 %1454, %v380_v20   ;;  %v388_v51 = vld [vmem:[%s1955_s2 + $0x88] sm:$0xff]  ;;  %v1019_v52 = vld [vmem:[%s1957_s4] sm:$0xff]  ;;  %v1499_v54 = vld [vmem:[%s1954_s1 + $0x110] ss:$0 sps:$4 sm:$0xff]  }
  0x2e   : > { %v1020_v53 = vld [vmem:[%s1957_s4 + $0x8] sm:$0xff]  ;;  %v1021_v55 = vld [vmem:[%s1957_s4 + $0x10] sm:$0x3]  ;;  %v1478_v56 = vld [vmem:[%s1954_s1 + $0x78] ss:$12 sps:$4 sm:$0xff]  }
  0x2f   : > { %1400 = vmatpush3.bf16.msra.mxu1 %v318_v6  ;;  %426 = vperm.xlu0 %1453, %v377_v22   ;;  %v1479_v57 = vld [vmem:[%s1954_s1 + $0x94] ss:$12 sps:$4 sm:$0xff]   ;;  %v1481_v58 = vld [vmem:[%s1954_s1 + $0x90] ss:$12 sps:$4 sm:$0xff]   ;;  %v1484_v59 = vld [vmem:[%s1954_s1 + $0xac] ss:$12 sps:$4 sm:$0xff]  }
  0x30   : > { %1295 = vmatpush3.bf16.msra.mxu0 %v302_v12  ;;  %1062 = vmatprep.subr.bf16.mxu1 %v1531_v2  ;;  %v1486_v60 = vld [vmem:[%s1954_s1 + $0xa8] ss:$12 sps:$4 sm:$0xff]   ;;  %v1487_v61 = vld [vmem:[%s1954_s1 + $0xc4] ss:$12 sps:$4 sm:$0xff]   ;;  %v1489_v62 = vld [vmem:[%s1954_s1 + $0xc0] ss:$12 sps:$4 sm:$0xff]  }
  0x31   : > { %431 = vperm.xlu1 %1454, %v378_v23   ;;  %v1492_v63 = vld [vmem:[%s1954_s1 + $0xdc] ss:$12 sps:$4 sm:$0xff]   ;;  %v1494_v0 = vld [vmem:[%s1954_s1 + $0xd8] ss:$12 sps:$4 sm:$0xff]   ;;  %v1495_v1 = vld [vmem:[%s1954_s1 + $0xf4] ss:$12 sps:$4 sm:$0xff]  }
  0x32   : > { %1402 = vmatmul.mubr.msk.bf16.vlgmr.msra.gmra.mxu1 %vm684_vm0, %v1459_v14  ;;  %v369_v3 = vld [vmem:[%s1954_s1 + $0x108] sm:$0xff]  ;;  %v1497_v4 = vld [vmem:[%s1954_s1 + $0xf0] ss:$12 sps:$4 sm:$0xff]  }
  0x33   : > { %758 = vmatmul.mubr.bf16.vlgmr.msra.gmra.mxu0 %v1455_v16  ;;  %1405 = vmatprep.mubr.msk.bf16.mxu1 %vm684_vm0, %v1466_v17  ;;  %v1252_v5 = vcombine.high %v369_v3, %v369_v3  ;;  %v1251_v6 = vcombine.low %v369_v3, %v369_v3  ;;  %v1504_v17 = vld [vmem:[%s1956_s3 + $0x4] ss:$8 sps:$4 sm:$0xff]  }
  0x34   : > { %765 = vmatprep.mubr.bf16.mxu0 %v1460_v18  ;;  %416 = vperm.xlu0 %1453, %v375_v27  }
  0x35   : > { %421 = vperm.xlu1 %1454, %v376_v28  }
  0x38   : > { %406 = vperm.xlu0 %1453, %v373_v29  }
  0x39   : > { %411 = vperm.xlu1 %1454, %v374_v31  }
  0x3a   : > { %1406 = vmatmul.mubr.msk.bf16.gmra.mxu1 %vm684_vm0, %v1467_v21 }
  0x3b   : > { %766 = vmatmul.mubr.bf16.gmra.mxu0 %v1462_v24  ;;  %1409 = vmatprep.mubr.msk.bf16.mxu1 %vm684_vm0, %v1474_v25 }
  0x3c   : > { %773 = vmatprep.mubr.bf16.mxu0 %v1463_v26  ;;  %396 = vperm.xlu0 %1453, %v371_v35  }
  0x3d   : > { %401 = vperm.xlu1 %1454, %v372_v36  }
  0x40   : > { %506 = vperm.xlu0 %1453, %v393_v37  }
  0x41   : > { %496 = vperm.xlu1 %1454, %v391_v39  }
  0x42   : > { %1410 = vmatmul.mubr.msk.bf16.gmra.mxu1 %vm684_vm0, %v1475_v30 }
  0x43   : > { %774 = vmatmul.mubr.bf16.gmra.mxu0 %v1465_v32  ;;  %1413 = vmatprep.mubr.msk.bf16.mxu1 %vm684_vm0, %v1482_v33 }
  0x44   : > { %781 = vmatprep.mubr.bf16.mxu0 %v1468_v34  ;;  %501 = vperm.xlu0 %1453, %v392_v43  }
  0x45   : > { %486 = vperm.xlu1 %1454, %v389_v44  }
  0x48   : > { %491 = vperm.xlu0 %1453, %v390_v45  }
  0x49   : > { %476 = vperm.xlu1 %1454, %v387_v47  }
  0x4a   : > { %1414 = vmatmul.mubr.msk.bf16.gmra.mxu1 %vm684_vm0, %v1483_v38 }
  0x4b   : > { %782 = vmatmul.mubr.bf16.gmra.mxu0 %v1470_v40  ;;  %1417 = vmatprep.mubr.msk.bf16.mxu1 %vm684_vm0, %v1490_v41 }
  0x4c   : > { %789 = vmatprep.mubr.bf16.mxu0 %v1471_v42  ;;  %481 = vperm.xlu0 %1453, %v388_v51  }
  0x4d   : > { %1024 = vperm.xlu1 %1454, %v1019_v52  }
  0x50   : > { %1029 = vperm.xlu0 %1453, %v1020_v53  }
  0x51   : > { %1034 = vperm.xlu1 %1454, %v1021_v55  }
  0x52   : > { %1418 = vmatmul.mubr.msk.bf16.gmra.mxu1 %vm684_vm0, %v1491_v46 }
  0x53   : > { %790 = vmatmul.mubr.bf16.gmra.mxu0 %v1473_v48  ;;  %1421 = vmatprep.mubr.msk.bf16.mxu1 %vm684_vm0, %v1498_v49 }
  0x54   : > { %797 = vmatprep.mubr.bf16.mxu0 %v1476_v50 }
  0x5a   : > { %1422 = vmatmul.mubr.msk.bf16.gmra.mxu1 %vm684_vm0, %v1499_v54 }
  0x5b   : > { %798 = vmatmul.mubr.bf16.gmra.mxu0 %v1478_v56  ;;  %1270 = vmatprep.mubr.msk.bf16.mxu1 %vm1052_vm2, %v1504_v17 }
  0x5c   : > { %805 = vmatprep.mubr.bf16.mxu0 %v1479_v57 }
  0x63   : > { %806 = vmatmul.mubr.bf16.gmra.mxu0 %v1481_v58 }
  0x64   : > { %813 = vmatprep.mubr.bf16.mxu0 %v1484_v59 }
  0x6b   : > { %814 = vmatmul.mubr.bf16.gmra.mxu0 %v1486_v60 }
  0x6c   : > { %821 = vmatprep.mubr.bf16.mxu0 %v1487_v61 }
  0x73   : > { %822 = vmatmul.mubr.bf16.gmra.mxu0 %v1489_v62 }
  0x74   : > { %829 = vmatprep.mubr.bf16.mxu0 %v1492_v63 }
  0x7b   : > { %830 = vmatmul.mubr.bf16.gmra.mxu0 %v1494_v0 }
  0x7c   : > { %837 = vmatprep.mubr.bf16.mxu0 %v1495_v1 }
  0x83   : > { %838 = vmatmul.mubr.bf16.gmra.mxu0 %v1497_v4 }
  0x84   : > { %845 = vmatprep.mubr.bf16.mxu0 %v1252_v5 }
  0x8b   : > { %846 = vmatmul.mubr.bf16.gmra.mxu0 %v1251_v6 }
  0x9a   : > { %v1833_v7 = vpop.permute.xlu0 %466 }
  0x9c   : > { %v1835_v8 = vpop.permute.xlu1 %456 }
  0x9e   : > { %v1837_v9 = vpop.permute.xlu0 %471 }
  0xa0   : > { %v1839_v10 = vpop.permute.xlu1 %461 }
  0xa2   : > { %v1841_v11 = vpop.permute.xlu0 %446 }
  0xa4   : > { %v1843_v12 = vpop.permute.xlu1 %451 }
  0xa6   : > { %v1845_v13 = vpop.permute.xlu0 %436 }
  0xa8   : > { %v1847_v14 = vpop.permute.xlu1 %441 }
  0xaa   : > { %v1849_v15 = vpop.permute.xlu0 %426 }
  0xac   : > { %v1851_v16 = vpop.permute.xlu1 %431 }
  0xaf   : > { %v417_v18 = vpop.permute.xlu0 %416 }
  0xb0   : > { %v422_v19 = vpop.permute.xlu1 %421 }
  0xb3   : > { %v407_v20 = vpop.permute.xlu0 %406 }
  0xb4   : > { %v412_v23 = vpop.permute.xlu1 %411 }
  0xb7   : > { %v397_v26 = vpop.permute.xlu0 %396 }
  0xb8   : > { %v402_v33 = vpop.permute.xlu1 %401 }
  0xf2   : > { %v1403_v21 = vpop.f32.mrf.mxu1 }
  0xf3   : > { %v1296_v22 = vpop.f32.mrf.mxu0 }
  0xf4   : > { %v887_v24 = vpop.f32.mrf.mxu1 }
  0xf5   : > { %v1297_v25 = vpop.f32.mrf.mxu0 }
  0xf6   : > { %v1298_v27 = vadd.f32 %v1297_v25, %v1296_v22  ;;  %v1404_v28 = vpop.f32.mrf.mxu1 }
  0xf7   : > { %v1299_v29 = vpop.f32.mrf.mxu0 }
  0xf8   : > { %v760_v30 = vadd.f32 %v1298_v27, %v397_v26  ;;  %v890_v31 = vpop.f32.mrf.mxu1 }
  0xf9   : > { %v1300_v32 = vpop.f32.mrf.mxu0 }
  0xfa   : > { %v1301_v34 = vadd.f32 %v1300_v32, %v1299_v29  ;;  %v888_v35 = vadd.f32 %v887_v24, %v760_v30  ;;  %v1407_v36 = vpop.f32.mrf.mxu1 }
  0xfb   : > { %v1302_v37 = vpop.f32.mrf.mxu0 }
  0xfc   : > { %v763_v38 = vadd.f32 %v1301_v34, %v402_v33  ;;  %v903_v39 = vpop.f32.mrf.mxu1  ;;  %v981_v45 = vmax.f32 %v888_v35, 0.0 }
  0xfd   : > { %v1303_v40 = vpop.f32.mrf.mxu0 }
  0xfe   : > { %v1304_v41 = vadd.f32 %v1303_v40, %v1302_v37  ;;  %v891_v42 = vadd.f32 %v890_v31, %v763_v38  ;;  %v1408_v43 = vpop.f32.mrf.mxu1 }
  0xff   : > { %v1305_v44 = vpop.f32.mrf.mxu0 }
 0x100   : > { %v768_v46 = vadd.f32 %v1304_v41, %v407_v20  ;;  %v982_v47 = vmax.f32 %v891_v42, 0.0  ;;  %v906_v48 = vpop.f32.mrf.mxu1 }
 0x101   : > { %v1306_v49 = vpop.f32.mrf.mxu0 }
 0x102   : > { %v896_v50 = vadd.f32 %v1403_v21, %v768_v46  ;;  %v1857_v51 = vpack.c.bf16 %v982_v47, %v981_v45  ;;  %v1307_v52 = vadd.f32 %v1306_v49, %v1305_v44  ;;  %v1859_v53 = vpop.f32.mrf.mxu1 }
 0x103   : > { %v1308_v54 = vpop.f32.mrf.mxu0 }
 0x104   : > { %v771_v55 = vadd.f32 %v1307_v52, %v412_v23  ;;  %v1861_v56 = vpop.f32.mrf.mxu1  ;;  %v983_v62 = vmax.f32 %v896_v50, 0.0 }
 0x105   : > { %v1309_v57 = vpop.f32.mrf.mxu0 }
 0x106   : > { %v899_v58 = vadd.f32 %v1404_v28, %v771_v55  ;;  %v1310_v59 = vadd.f32 %v1309_v57, %v1308_v54  ;;  %v1863_v60 = vpop.f32.mrf.mxu1 }
 0x107   : > { %v1311_v61 = vpop.f32.mrf.mxu0 }
 0x108   : > { %v984_v63 = vmax.f32 %v899_v58, 0.0  ;;  %v776_v0 = vadd.f32 %v1310_v59, %v417_v18  ;;  %v1865_v1 = vpop.f32.mrf.mxu1  ;;  %v1889_v58 = vpop.permute.xlu0 %506 }
 0x109   : > { %v1312_v3 = vpop.f32.mrf.mxu0 }
 0x10a   : > { %v1867_v4 = vpack.c.bf16 %v984_v63, %v983_v62  ;;  %v1313_v5 = vadd.f32 %v1312_v3, %v1311_v61  ;;  %v904_v6 = vadd.f32 %v903_v39, %v776_v0  ;;  %v1415_v17 = vpop.f32.mrf.mxu1  ;;  %v1891_v61 = vpop.permute.xlu1 %496 }
 0x10b   : > { %v1314_v20 = vpop.f32.mrf.mxu0 }
 0x10c   : > { %v779_v21 = vadd.f32 %v1313_v5, %v422_v19  ;;  %v1869_v22 = vpop.f32.mrf.mxu1  ;;  %v985_v28 = vmax.f32 %v904_v6, 0.0  ;;  %v1893_v5 = vpop.permute.xlu0 %501 }
 0x10d   : > { %v1315_v23 = vpop.f32.mrf.mxu0 }
 0x10e   : > { %v1316_v24 = vadd.f32 %v1315_v23, %v1314_v20  ;;  %v907_v25 = vadd.f32 %v906_v48, %v779_v21  ;;  %v1416_v26 = vpop.f32.mrf.mxu1  ;;  %v487_v23 = vpop.permute.xlu1 %486 }
 0x10f   : > { %v1317_v27 = vpop.f32.mrf.mxu0 }
 0x110   : > { %v784_v18 = vadd.f32 %v1316_v24, %v1849_v15  ;;  %v986_v29 = vmax.f32 %v907_v25, 0.0  ;;  %v938_v30 = vpop.f32.mrf.mxu1 }
 0x111   : > { %v1318_v31 = vpop.f32.mrf.mxu0 }
 0x112   : > { %v1872_v32 = vpack.c.bf16 %v986_v29, %v985_v28  ;;  %v1319_v33 = vadd.f32 %v1318_v31, %v1317_v27  ;;  %v1874_v34 = vpop.f32.mrf.mxu1  ;;  %v912_v19 = vadd.f32 %v1407_v36, %v784_v18 }
 0x113   : > { %v1320_v35 = vpop.f32.mrf.mxu0 }
 0x114   : > { %v787_v37 = vadd.f32 %v1319_v33, %v1851_v16  ;;  %v1877_v38 = vpop.f32.mrf.mxu1  ;;  %v987_v15 = vmax.f32 %v912_v19, 0.0 }
 0x115   : > { %v1321_v39 = vpop.f32.mrf.mxu0 }
 0x116   : > { %v915_v40 = vadd.f32 %v1408_v43, %v787_v37  ;;  %v1879_v41 = vpop.f32.mrf.mxu1 }
 0x117   : > { %v1323_v42 = vpop.f32.mrf.mxu0 }
 0x118   : > { %v988_v44 = vmax.f32 %v915_v40, 0.0  ;;  %v1881_v45 = vpop.f32.mrf.mxu1  ;;  %v492_v40 = vpop.permute.xlu0 %491 }
 0x119   : > { %v1324_v46 = vpop.f32.mrf.mxu0 }
 0x11a   : > { %v1883_v47 = vpack.c.bf16 %v988_v44, %v987_v15  ;;  %v1885_v48 = vpop.f32.mrf.mxu1  ;;  %v1325_v37 = vadd.f32 %v1324_v46, %v1323_v42 }
 0x11b   : > { %v1326_v49 = vpop.f32.mrf.mxu0 }
 0x11c   : > { %v1887_v36 = vpop.f32.mrf.mxu1 }
 0x11d   : > { %v1327_v16 = vpop.f32.mrf.mxu0 }
 0x11e   : > { %v1424_v50 = vpop.f32.mrf.mxu1  ;;  %v1328_v18 = vadd.f32 %v1327_v16, %v1326_v49 }
 0x11f   : > { %v1329_v52 = vpop.f32.mrf.mxu0 }
 0x121   : > { %v1330_v54 = vpop.f32.mrf.mxu0 }
 0x122   : > { %v1331_v25 = vadd.f32 %v1330_v54, %v1329_v52  ;;  %v800_v52 = vadd.f32 %v1328_v18, %v1841_v11 }
 0x123   : > { %v1332_v43 = vpop.f32.mrf.mxu0 }
 0x124   : > { %v803_v44 = vadd.f32 %v1331_v25, %v1843_v12  ;;  %v928_v11 = vadd.f32 %v1859_v53, %v800_v52 }
 0x125   : > { %v1333_v55 = vpop.f32.mrf.mxu0 }
 0x126   : > { %v1334_v20 = vadd.f32 %v1333_v55, %v1332_v43  ;;  %v1322_v55 = vadd.f32 %v1321_v39, %v1320_v35  ;;  %v931_v46 = vadd.f32 %v1863_v60, %v803_v44  ;;  %v482_v35 = vpop.permute.xlu0 %481 }
 0x127   : > { %v1335_v57 = vpop.f32.mrf.mxu0 }
 0x128   : > { %v808_v31 = vadd.f32 %v1334_v20, %v1835_v8  ;;  %v992_v60 = vmax.f32 %v931_v46, 0.0 }
 0x129   : > { %v1336_v59 = vpop.f32.mrf.mxu0 }
 0x12a   : > { %v1337_v0 = vadd.f32 %v1336_v59, %v1335_v57  ;;  %v936_v49 = vadd.f32 %v1869_v22, %v808_v31 }
 0x12b   : > { %v1338_v62 = vpop.f32.mrf.mxu0 }
 0x12c   : > { %v811_v27 = vadd.f32 %v1337_v0, %v1839_v10  ;;  %v477_v10 = vpop.permute.xlu1 %476  ;;  %v993_v59 = vmax.f32 %v936_v49, 0.0 }
 0x12d   : > { %v1339_v63 = vpop.f32.mrf.mxu0 }
 0x12e   : > { %v1340_v3 = vadd.f32 %v1339_v63, %v1338_v62  ;;  %v939_v50 = vadd.f32 %v938_v30, %v811_v27 }
 0x12f   : > { %v1341_v6 = vpop.f32.mrf.mxu0 }
 0x130   : > { %v816_v21 = vadd.f32 %v1340_v3, %v1833_v7  ;;  %v994_v57 = vmax.f32 %v939_v50, 0.0 }
 0x131   : > { %v1342_v24 = vpop.f32.mrf.mxu0 }
 0x132   : > { %v1343_v28 = vadd.f32 %v1342_v24, %v1341_v6  ;;  %v944_v33 = vadd.f32 %v1415_v17, %v816_v21  ;;  %v1013_v0 = vpack.c.bf16 %v994_v57, %v993_v59  ;;  %v991_v21 = vmax.f32 %v928_v11, 0.0  ;;  %v1025_v57 = vpop.permute.xlu1 %1024 }
 0x133   : > { %v1344_v29 = vpop.f32.mrf.mxu0 }
 0x134   : > { %v819_v19 = vadd.f32 %v1343_v28, %v1837_v9  ;;  %v995_v16 = vmax.f32 %v944_v33, 0.0  ;;  %v795_v9 = vadd.f32 %v1325_v37, %v1847_v14  ;;  %v1012_v27 = vpack.c.bf16 %v992_v60, %v991_v21 }
 0x135   : > { %v1345_v15 = vpop.f32.mrf.mxu0 }
 0x136   : > { %v947_v7 = vadd.f32 %v1416_v26, %v819_v19  ;;  %v1346_v43 = vadd.f32 %v1345_v15, %v1344_v29  ;;  %v792_v26 = vadd.f32 %v1322_v55, %v1845_v13  ;;  %v923_v63 = vadd.f32 %v1865_v1, %v795_v9 }
 0x137   : > { %v1347_v54 = vpop.f32.mrf.mxu0 }
 0x138   : > { %v996_v8 = vmax.f32 %v947_v7, 0.0  ;;  %v824_v17 = vadd.f32 %v1346_v43, %v477_v10  ;;  %v920_v13 = vadd.f32 %v1861_v56, %v792_v26  ;;  %v990_v1 = vmax.f32 %v923_v63, 0.0 }
 0x139   : > { %v1348_v42 = vpop.f32.mrf.mxu0 }
 0x13a   : > { %v1014_v12 = vpack.c.bf16 %v996_v8, %v995_v16  ;;  %v1349_v30 = vadd.f32 %v1348_v42, %v1347_v54  ;;  %v952_v22 = vadd.f32 %v1877_v38, %v824_v17  ;;  %v989_v31 = vmax.f32 %v920_v13, 0.0  ;;  %v970_v8 = vpop.f32.mrf.mxu1 }
 0x13b   : > { %v1350_v39 = vpop.f32.mrf.mxu0 }
 0x13c   : > { %1063 = vmatpush1.bf16.msra.mxu1 %v1014_v12  ;;  %v827_v62 = vadd.f32 %v1349_v30, %v482_v35  ;;  %v997_v53 = vmax.f32 %v952_v22, 0.0  ;;  %v1011_v19 = vpack.c.bf16 %v990_v1, %v989_v31  ;;  %v1030_v35 = vpop.permute.xlu0 %1029 }
 0x13d   : > { %v1351_v14 = vpop.f32.mrf.mxu0  ;;  %1064 = vmatprep.subr.bf16.mxu1 %v1531_v2 }
 0x13e   : > { %v1352_v3 = vadd.f32 %v1351_v14, %v1350_v39  ;;  %v955_v6 = vadd.f32 %v1881_v45, %v827_v62  ;;  %v1035_v62 = vpop.permute.xlu1 %1034 }
 0x13f   : > { %v1353_v20 = vpop.f32.mrf.mxu0 }
 0x140   : > { %v832_v24 = vadd.f32 %v1352_v3, %v487_v23  ;;  %v998_v25 = vmax.f32 %v955_v6, 0.0  ;;  %1065 = vmatpush1.bf16.msra.mxu1 %v1013_v0 }
 0x141   : > { %v1354_v38 = vpop.f32.mrf.mxu0  ;;  %1066 = vmatprep.subr.bf16.mxu1 %v1531_v2 }
 0x142   : > { %v1015_v28 = vpack.c.bf16 %v998_v25, %v997_v53  ;;  %v1355_v18 = vadd.f32 %v1354_v38, %v1353_v20  ;;  %v960_v33 = vadd.f32 %v1874_v34, %v832_v24 }
 0x143   : > { %v1356_v29 = vpop.f32.mrf.mxu0 }
 0x144   : > { %v835_v45 = vadd.f32 %v1355_v18, %v492_v40  ;;  %1067 = vmatpush1.bf16.msra.mxu1 %v1012_v27  ;;  %v999_v15 = vmax.f32 %v960_v33, 0.0 }
 0x145   : > { %v1357_v56 = vpop.f32.mrf.mxu0  ;;  %1068 = vmatprep.subr.bf16.mxu1 %v1531_v2 }
 0x146   : > { %v963_v23 = vadd.f32 %v1879_v41, %v835_v45  ;;  %v1358_v10 = vadd.f32 %v1357_v56, %v1356_v29 }
 0x147   : > { %v1359_v37 = vpop.f32.mrf.mxu0 }
 0x148   : > { %v1000_v44 = vmax.f32 %v963_v23, 0.0  ;;  %1069 = vmatpush1.bf16.msra.mxu1 %v1011_v19 }
 0x149   : > { %v1360_v50 = vpop.f32.mrf.mxu0  ;;  %1070 = vmatprep.subr.bf16.mxu1 %v1531_v2 }
 0x14a   : > { %v1016_v7 = vpack.c.bf16 %v1000_v44, %v999_v15  ;;  %v1361_v40 = vadd.f32 %v1360_v50, %v1359_v37 }
 0x14b   : > { %v1362_v43 = vpop.f32.mrf.mxu0 }
 0x14c   : > { %1071 = vmatpush1.bf16.msra.mxu1 %v1883_v47  ;;  %v843_v16 = vadd.f32 %v1361_v40, %v1893_v5  ;;  %v840_v47 = vadd.f32 %v1358_v10, %v1891_v61 }
 0x14d   : > { %v1363_v34 = vpop.f32.mrf.mxu0  ;;  %1072 = vmatprep.subr.bf16.mxu1 %v1531_v2 }
 0x14e   : > { %v1364_v55 = vadd.f32 %v1363_v34, %v1362_v43  ;;  %v971_v9 = vadd.f32 %v970_v8, %v843_v16 }
 0x14f   : > { %v1365_v52 = vpop.f32.mrf.mxu0 }
 0x150   : > { %v848_v41 = vadd.f32 %v1364_v55, %v1889_v58  ;;  %1073 = vmatpush1.bf16.msra.mxu1 %v1872_v32  ;;  %v968_v58 = vadd.f32 %v1887_v36, %v840_v47  ;;  %v1002_v32 = vmax.f32 %v971_v9, 0.0 }
 0x151   : > { %v1366_v54 = vpop.f32.mrf.mxu0  ;;  %1074 = vmatprep.subr.bf16.mxu1 %v1531_v2 }
 0x152   : > { %v976_v49 = vadd.f32 %v1885_v48, %v848_v41  ;;  %v1001_v5 = vmax.f32 %v968_v58, 0.0 }
 0x154   : > { %v1003_v17 = vmax.f32 %v976_v49, 0.0  ;;  %1075 = vmatpush1.bf16.msra.mxu1 %v1867_v4  ;;  %v1017_v61 = vpack.c.bf16 %v1002_v32, %v1001_v5  ;;  %v1502_v4 = vld [vmem:[%s1956_s3] ss:$8 sps:$4 sm:$0xff]  }
 0x155   : > { %1076 = vmatprep.subr.bf16.mxu1 %v1531_v2 }
 0x156   : > { %v1018_v42 = vpack.c.bf16 %v1003_v17, %v1003_v17 }
 0x158   : > { %1077 = vmatpush1.bf16.msra.mxu1 %v1857_v51  ;;  %v1060_v48 = vsel %vm721_vm1, %v1018_v42, 0  ;;  %v1006_v51 = vld [vmem:[%s1956_s3 + $0x10] sm:$0x11] }
 0x159   : > { %1086 = vmatprep.subr.bf16.mxu1 %v1531_v2  ;;  %v1269_v36 = vcombine.high %v1006_v51, %v1006_v51  ;;  %v1268_v46 = vcombine.low %v1006_v51, %v1006_v51 }
 0x15c   : > { %1087 = vmatpush2.bf16.msra.mxu1 %v1060_v48 }
 0x15d   : > { %1088 = vmatprep.subr.bf16.mxu1 %v1531_v2 }
 0x160   : > { %1089 = vmatpush2.bf16.msra.mxu1 %v1017_v61 }
 0x161   : > { %1090 = vmatprep.subr.bf16.mxu1 %v1531_v2 }
 0x164   : > { %1091 = vmatpush2.bf16.msra.mxu1 %v1016_v7 }
 0x165   : > { %1092 = vmatprep.subr.bf16.mxu1 %v1531_v2 }
 0x168   : > { %1093 = vmatpush2.bf16.msra.mxu1 %v1015_v28 }
 0x16b   : > { %1095 = vmatmul.mubr.bf16.vlgmr.msra.gmra.mxu1 %v1502_v4 }
 0x16c   : > { %1271 = vmatprep.mubr.msk.bf16.mxu1 %vm1052_vm2, %v1269_v36 }
 0x173   : > { %1103 = vmatmul.mubr.bf16.gmra.mxu1 %v1268_v46 }
 0x22b   : > { %v1096_v12 = vpop.f32.mrf.mxu1 }
 0x22c   : > { %v1097_v30 = vadd.f32 %v1096_v12, %v1025_v57 }
 0x22d   : > { %v1098_v2 = vpop.f32.mrf.mxu1 }
 0x22e   : > { %v1277_v26 = vpack.c.bf16 %v1097_v30, %v1097_v30 }
 0x22f   : > { %v1099_v39 = vpop.f32.mrf.mxu1 }
 0x230   : > { %1124 = vst.msk [vmem:[%s255_s6] sm:$0xf] %vm1123_vm3, %v1277_v26  ;;  %v1100_v11 = vadd.f32 %v1099_v39, %v1030_v35 }
 0x231   : > { %v1101_v59 = vpop.f32.mrf.mxu1 }
 0x232   : > { %v1278_v22 = vpack.c.bf16 %v1100_v11, %v1100_v11 }
 0x233   : > { %v1104_v63 = vpop.f32.mrf.mxu1 }
 0x234   : > { %1125 = vst.msk [vmem:[%s255_s6 + $0x4] sm:$0xf] %vm1123_vm3, %v1278_v22  ;;  %v1105_v14 = vadd.f32 %v1104_v63, %v1035_v62 }
 0x235   : > { %v1106_v60 = vpop.f32.mrf.mxu1 }
 0x236   : > { %v1279_v0 = vpack.c.bf16 %v1105_v14, %v1105_v14 }
 0x237   : > { %v1107_v3 = vpop.f32.mrf.mxu1 }
 0x238   : > { %1127 = vst.msk [vmem:[%s255_s6 + $0x8] sm:$0x1] %vm1126_vm4, %v1279_v0 }
 0x239   : > { %v1108_v6 = vpop.f32.mrf.mxu1 }
 0x23a PF: > { %s15_s20 = sadd.s32 1, %s1529_s20   ;;  %s1959_s18 = smov %s1525_s19 }
 0x23b   : > { %p12_p5 = scmp.ge.s32.totalorder %s15_s20, 4   ;;  %s1960_s19 = smov %s1962_s21 }
 0x23d   :  { %14 = sbr.rel (!%p12_p5) target bundleno = 2 (0x2), region = 70 }

// kernel: hrnet_w48_up8_head_forward.4
= control target key start
LH: loop header
LB: loop body
LE: loop exit
PB: predicated region body
PF: predicated region fallthrough
CT: control target
= control target key end

     0   :  { %s510_s9 = smov 0   ;;  %s512_s10 = smov 0   ;;  %s567_s0 = inlined_call_operand.vmem [shape: bf16[2,2,24,24], index: 0, kind: input, shape index: {}]   ;;  %s568_s1 = inlined_call_operand.vmem [shape: bf16[24,64], index: 1, kind: input, shape index: {}]   ;;  %s569_s2 = inlined_call_operand.vmem [shape: bf16[2,2,24,64], index: 2, kind: output, shape index: {}]  }
   0x1   :  { %s514_s11 = smov 0   ;;  %s516_s12 = smov 0  }
   0x2   :  { %s518_s13 = smov 0  }
   0x3 LB: > { %s21_s14 = sadd.s32 1, %s485_s11  ;;  %s24_s15 = sadd.s32 1, %s489_s12  ;;  %s493_s13 = sphi %s518_s13, %s12_s13   ;;  %s489_s12 = sphi %s516_s12, %s573_s12   ;;  %s485_s11 = sphi %s514_s11, %s572_s11   ;;  %s481_s10 = sphi %s512_s10, %s571_s10   ;;  %s477_s9 = sphi %s510_s9, %s570_s9  }
   0x4   : > { %p22_p0 = scmp.ge.s32.totalorder %s21_s14, 2  ;;  %p379_p1 = scmp.ge.s32.totalorder %s493_s13, 1 }
   0x5   : > { %p132_p2 = scmp.lt.s32.totalorder %s493_s13, 5 }
   0x6   : > { %s575_s14 = smov (%p22_p0, %s21_s14), 0  ;;  %s577_s15 = smov (!%p22_p0, %s24_s15), %s489_s12 }
   0x7   : > { %p133_p3 = pnand %p379_p1, %p132_p2  ;;  %p26_p4 = scmp.ge.s32.totalorder %s577_s15, 2 }
   0x8   : > { %p162_p5 = scmp.lt.s32.totalorder (!%p133_p3), %s481_s10, 1  ;;  %p164_p6 = scmp.lt.s32.totalorder (!%p133_p3), %s477_s9, 1 }
   0x9   : > { %s579_s15 = smov (%p26_p4, %s577_s15), 0  ;;  %136 = sbr.rel (%p133_p3) target bundleno = 225 (0xe1), region = 28 }
   0xe   : > { %v451_v0 = vld [vmem:[%s568_s1 + $0x8] ss:$0 sps:$4 sm:$0xff]   ;;  %vm211_vm0 = vcmask 1043456   ;;  %v452_v1 = vld [vmem:[%s568_s1] sm:$0xff]   ;;  %s581_s10 = smov (!%p162_p5, %s481_s10), 1  ;;  %s583_s9 = smov (!%p164_p6, %s477_s9), 1 }
   0xf   : > { %408 = vmatprep.subr.msk.bf16.mxu0 %vm211_vm0, %v451_v0  ;;  %v213_v2 = vsel %vm211_vm0, %v451_v0, 0  ;;  %s410_s20 = smul.u32 6, %s581_s10  ;;  %vm204_vm1 = vcmask 195584   ;;  %vm276_vm2 = vcmask 519168  }
  0x10   : > { %401 = vmatpush3.bf16.msra.mxu0 %v213_v2  ;;  %s409_s21 = smul.u32 3, %s583_s9 }
  0x11   : > { %402 = vmatprep.subr.bf16.mxu0 %v452_v1 }
  0x12   : > { %s168_s22 = sadd.s32 %s410_s20, %s409_s21 }
  0x13   : > { %s380_s23 = sshll.u32 %s168_s22, 2 }
  0x14   : > { %403 = vmatpush3.bf16.msra.mxu0 %v452_v1  ;;  %s170_s26 = scalar_lea.vmem %s567_s0, %s380_s23  ;;  %s179_s29 = scalar_lea.vmem %s569_s2, %s380_s23 }
  0x15   : > { %v453_v3 = vld [vmem:[%s170_s26] sm:$0xff]   ;;  %v454_v4 = vld [vmem:[%s170_s26 + $0x8] ss:$0 sps:$4 sm:$0xff]  }
  0x16   : > { %404 = vmatprep.mubr.msk.bf16.mxu0 %vm204_vm1, %v453_v3 }
  0x17   : > { %405 = vmatmul.mubr.msk.bf16.vlgmr.msra.gmra.mxu0 %vm204_vm1, %v454_v4 }
  0xd7   : > { %v406_v5 = vpop.f32.mrf.mxu0 }
  0xd8   : > { %v395_v6 = vpack.c.bf16 %v406_v5, %v406_v5 }
  0xd9   : > { %v249_v7 = vpop.f32.mrf.mxu0 }
  0xda   : > { %279 = vst.msk [vmem:[%s179_s29 + $0x8] sm:$0xf] %vm276_vm2, %v395_v6  ;;  %v393_v8 = vpack.c.bf16 %v249_v7, %v249_v7 }
  0xdb   : > { %v407_v9 = vpop.f32.mrf.mxu0 }
  0xdc   : > { %277 = vst.msk [vmem:[%s179_s29] sm:$0xf] %vm276_vm2, %v393_v8 }
  0xdd   : > { %v252_v10 = vpop.f32.mrf.mxu0 }
  0xde   : > { %v394_v11 = vpack.c.bf16 %v252_v10, %v252_v10 }
  0xe0   : > { %278 = vst.msk [vmem:[%s179_s29 + $0x4] sm:$0xf] %vm276_vm2, %v394_v11 }
  0xe1 PF: > { %s12_s13 = sadd.s32 1, %s493_s13   ;;  %s570_s9 = smov %s485_s11 }
  0xe2   : > { %p9_p7 = scmp.ge.s32.totalorder %s12_s13, 6   ;;  %s571_s10 = smov %s489_s12 }
  0xe3   : > { %s572_s11 = smov %s575_s14  ;;  %s573_s12 = smov %s579_s15 }
  0xe4   :  { %11 = sbr.rel (!%p9_p7) target bundleno = 3 (0x3), region = 58 }

// kernel: hrnet_w48_up8_head_forward.5
= control target key start
LH: loop header
LB: loop body
LE: loop exit
PB: predicated region body
PF: predicated region fallthrough
CT: control target
= control target key end

     0   :  { %7 = vsyncpa [#allocation3], 0  ;;  %s979_s0 = inlined_call_operand.vmem [shape: bf16[2,2,24,64], index: 0, kind: input, shape index: {}]   ;;  %s980_s1 = inlined_call_operand.vmem [shape: bf16[64,24], index: 1, kind: input, shape index: {}]   ;;  %s981_s2 = inlined_call_operand.hbm [shape: f32[2,2,64,64], index: 2, kind: output, shape index: {}]  }
   0x1   :  { %9 = vsyncpa [#allocation3 + $0x1], 0  ;;  %s794_s9 = smov 0   ;;  %s796_s10 = smov 0  }
   0x2   :  { %s798_s11 = smov 0   ;;  %s800_s12 = smov 0  }
   0x3   :  { %s802_s13 = smov 0   ;;  %s804_s14 = smov 0  }
   0x4 LB: > { %s545_s15 = sadd.s32 4294967295, %s774_s14   ;;  %s546_s16 = sadd.s32 4294967294, %s774_s14   ;;  %s774_s14 = sphi %s804_s14, %s15_s14   ;;  %s770_s13 = sphi %s802_s13, %s988_s13   ;;  %s766_s12 = sphi %s800_s12, %s987_s12   ;;  %s762_s11 = sphi %s798_s11, %s986_s11   ;;  %s758_s10 = sphi %s796_s10, %s985_s10   ;;  %s754_s9 = sphi %s794_s9, %s984_s9  }
   0x5   : > { %s27_s17 = sadd.s32 1, %s770_s13  ;;  %s88_s18 = sadd.s32 1, %s762_s11 }
   0x6   : > { %p29_p0 = scmp.ge.s32.totalorder %s27_s17, 2  ;;  %p98_p1 = scmp.ne.s32.totalorder %s762_s11, %s758_s10 }
   0x7   : > { %p99_p2 = scmp.eq.s32.totalorder %s545_s15, 1  ;;  %p104_p3 = scmp.ne.s32.totalorder %s758_s10, %s754_s9 }
   0x8   : > { %s990_s17 = smov (%p29_p0, %s27_s17), 0  ;;  %p105_p5 = scmp.eq.s32.totalorder %s546_s16, 1 }
   0x9   : > { %p834_p4 = por %p99_p2, %p98_p1  ;;  %s83_s20 = ssub.s32 %s770_s13, %s990_s17 }
   0xa   : > { %p550_p6 = scmp.ge.s32.totalorder %s774_s14, 1  ;;  %p86_p7 = scmp.eq.s32.totalorder %s83_s20, 0 }
   0xb   : > { %p841_p8 = por %p105_p5, %p104_p3  ;;  %p140_p9 = scmp.lt.s32.totalorder %s774_s14, 3 }
   0xc   : > { %s847_s22 = scalar_select %p86_p7, %s762_s11, %s88_s18  }
   0xd   : > { %p141_p10 = pnand %p550_p6, %p140_p9 }
   0xe   : > { %p167_p11 = scmp.lt.s32.totalorder (!%p141_p10), %s766_s12, 1  ;;  %s164_s26 = sand.u32 (!%p141_p10), 1, %s758_s10  }
   0xf   : > { %144 = sbr.rel (%p141_p10) target bundleno = 255 (0xff), region = 28  ;;  %s551_s27 = sshll.u32 (!%p141_p10), %s164_s26, 7 }
  0x10   : > { %s589_s29 = sshll.u32 (!%p141_p10), %s766_s12, 11  ;;  %s776_s7 = smov (!%p141_p10), [#allocation2]  }
  0x11   : > { %s922_s5 = scalar_lea.hbm (!%p141_p10), %s981_s2, %s589_s29  ;;  %s702_s8 = sshll.u32 (!%p141_p10), %s776_s7, 4  ;;  %s703_s8 = int_to_ptr.vmem [resolvable:$false] %s702_s8 }
  0x12   : > { %s704_s15 = scalar_lea.vmem (!%p141_p10), %s703_s8, 4096 }
  0x14   : > { %v690_v0 = vld [vmem:[%s980_s1] sm:$0xff]   ;;  %vm220_vm0 = vcmask 195584   ;;  %s168_s25 = scalar_select %p167_p11, %s766_s12, 1  ;;  %vm233_vm1 = vcmask 1043456   ;;  %v692_v8 = vld [vmem:[%s980_s1 + $0x8] sm:$0xff]   ;;  %v694_v10 = vld [vmem:[%s980_s1 + $0x10] sm:$0xff]  }
  0x15   : > { %v691_v1 = vld [vmem:[%s980_s1] sm:$0xff]   ;;  %606 = vmatprep.mubr.msk.bf16.mxu0 %vm220_vm0, %v690_v0  ;;  %v693_v9 = vld [vmem:[%s980_s1 + $0x8] sm:$0xff]   ;;  %v695_v11 = vld [vmem:[%s980_s1 + $0x10] sm:$0xff]   ;;  %vm302_vm2 = vcmask 523264   ;;  %s934_s12 = scalar_lea.sflag [#allocation3], %s164_s26 }
  0x16   : > { %s628_s28 = smul.u32 24, %s168_s25  ;;  %618 = vmatprep.mubr.msk.bf16.mxu1 %vm220_vm0, %v691_v1  ;;  %v696_v12 = vld [vmem:[%s980_s1 + $0x18] sm:$0xff]  }
  0x17   : > { %v697_v13 = vld [vmem:[%s980_s1 + $0x18] sm:$0xff]  }
  0x18   : > { %s171_s3 = scalar_lea.vmem %s979_s0, %s628_s28  ;;  %s889_s28 = scalar_lea.vmem [#allocation2], %s551_s27 }
  0x19   : > { %v686_v2 = vld [vmem:[%s171_s3 + $0x8] ss:$0 sps:$4 sm:$0xff]   ;;  %v687_v3 = vld [vmem:[%s171_s3 + $0x14] ss:$0 sps:$4 sm:$0xff]   ;;  %v688_v5 = vld [vmem:[%s171_s3] sm:$0xff]   ;;  %s457_s30 = sshll.u32 %s889_s28, 4  ;;  %s924_s30 = int_to_ptr.vmem [resolvable:$true] %s457_s30 }
  0x1a   : > { %626 = vmatprep.subr.msk.bf16.mxu0 %vm233_vm1, %v686_v2  ;;  %v235_v4 = vsel %vm233_vm1, %v686_v2, 0  ;;  %627 = vmatprep.subr.msk.bf16.mxu1 %vm233_vm1, %v687_v3  ;;  %v365_v6 = vsel %vm233_vm1, %v687_v3, 0  ;;  %v689_v7 = vld [vmem:[%s171_s3 + $0xc] sm:$0xff]   ;;  %s698_s6 = scalar_lea.vmem %s924_s30, 2048  ;;  %p705_p1 = scmp.lt.s32.totalorder %s924_s30, %s703_s8 }
  0x1b   : > { %603 = vmatpush3.bf16.msra.mxu0 %v235_v4  ;;  %615 = vmatpush3.bf16.msra.mxu1 %v365_v6  ;;  %p699_p12 = scmp.ne.s32.totalorder %s924_s30, %s698_s6  ;;  %p706_p2 = scmp.lt.s32.totalorder %s704_s15, %s698_s6 }
  0x1c   : > { %604 = vmatprep.subr.bf16.mxu0 %v688_v5  ;;  %616 = vmatprep.subr.bf16.mxu1 %v689_v7 }
  0x1d   : > { %p700_p13 = pnand %p699_p12, %p834_p4  ;;  %p707_p3 = por %p706_p2, %p705_p1 }
  0x1f   : > { %605 = vmatpush3.bf16.msra.mxu0 %v688_v5  ;;  %617 = vmatpush3.bf16.msra.mxu1 %v689_v7  ;;  %p701_p0 = pneg %p700_p13 }
  0x21   : > { %p708_p5 = pnand %p707_p3, %p701_p0 }
  0x22   : > { %607 = vmatmul.mubr.msk.bf16.vlgmr.msra.gmra.mxu0 %vm220_vm0, %v692_v8  ;;  %619 = vmatmul.mubr.msk.bf16.vlgmr.msra.gmra.mxu1 %vm220_vm0, %v693_v9 }
  0x23   : > { %610 = vmatprep.mubr.msk.bf16.mxu0 %vm220_vm0, %v694_v10  ;;  %622 = vmatprep.mubr.msk.bf16.mxu1 %vm220_vm0, %v695_v11 }
  0x2a   : > { %611 = vmatmul.mubr.msk.bf16.gmra.mxu0 %vm220_vm0, %v696_v12  ;;  %623 = vmatmul.mubr.msk.bf16.gmra.mxu1 %vm220_vm0, %v697_v13 }
  0xe2   : > { %v608_v14 = vpop.f32.mrf.mxu0  ;;  %v620_v15 = vpop.f32.mrf.mxu1 }
  0xe3   : > { %305 = vst.msk [vmem:[%s889_s28 + $0x10] sm:$0xff] %vm302_vm2, %v608_v14  ;;  %578 = vst.msk [vmem:[%s889_s28 + $0x50] sm:$0xff] %vm302_vm2, %v620_v15 }
  0xe4   : > { %v271_v16 = vpop.f32.mrf.mxu0  ;;  %v401_v17 = vpop.f32.mrf.mxu1 }
  0xe5   : > { %303 = vst.msk [vmem:[%s889_s28] sm:$0xff] %vm302_vm2, %v271_v16  ;;  %576 = vst.msk [vmem:[%s889_s28 + $0x40] sm:$0xff] %vm302_vm2, %v401_v17 }
  0xe6   : > { %v609_v18 = vpop.f32.mrf.mxu0  ;;  %v621_v19 = vpop.f32.mrf.mxu1 }
  0xe7   : > { %306 = vst.msk [vmem:[%s889_s28 + $0x18] sm:$0xff] %vm302_vm2, %v609_v18  ;;  %579 = vst.msk [vmem:[%s889_s28 + $0x58] sm:$0xff] %vm302_vm2, %v621_v19 }
  0xe8   : > { %v274_v20 = vpop.f32.mrf.mxu0  ;;  %v404_v21 = vpop.f32.mrf.mxu1 }
  0xe9   : > { %304 = vst.msk [vmem:[%s889_s28 + $0x8] sm:$0xff] %vm302_vm2, %v274_v20  ;;  %577 = vst.msk [vmem:[%s889_s28 + $0x48] sm:$0xff] %vm302_vm2, %v404_v21 }
  0xea   : > { %v612_v22 = vpop.f32.mrf.mxu0  ;;  %v624_v23 = vpop.f32.mrf.mxu1 }
  0xeb   : > { %309 = vst.msk [vmem:[%s889_s28 + $0x30] sm:$0xff] %vm302_vm2, %v612_v22  ;;  %582 = vst.msk [vmem:[%s889_s28 + $0x70] sm:$0xff] %vm302_vm2, %v624_v23 }
  0xec   : > { %v287_v24 = vpop.f32.mrf.mxu0  ;;  %v417_v25 = vpop.f32.mrf.mxu1 }
  0xed   : > { %307 = vst.msk [vmem:[%s889_s28 + $0x20] sm:$0xff] %vm302_vm2, %v287_v24  ;;  %580 = vst.msk [vmem:[%s889_s28 + $0x60] sm:$0xff] %vm302_vm2, %v417_v25 }
  0xee   : > { %v613_v26 = vpop.f32.mrf.mxu0  ;;  %v625_v27 = vpop.f32.mrf.mxu1 }
  0xef   : > { %310 = vst.msk [vmem:[%s889_s28 + $0x38] sm:$0xff] %vm302_vm2, %v613_v26  ;;  %583 = vst.msk [vmem:[%s889_s28 + $0x78] sm:$0xff] %vm302_vm2, %v625_v27 }
  0xf0   : > { %v290_v28 = vpop.f32.mrf.mxu0  ;;  %v420_v29 = vpop.f32.mrf.mxu1 }
  0xf1   : > { %308 = vst.msk [vmem:[%s889_s28 + $0x28] sm:$0xff] %vm302_vm2, %v290_v28  ;;  %581 = vst.msk [vmem:[%s889_s28 + $0x68] sm:$0xff] %vm302_vm2, %v420_v29 }
  0xf2   : > { %711 = shalt.err (!%p708_p5)
}
  0xf3   : > { %s712_s16 = scalar_lea.hbm %s922_s5, 2048  ;;  %s716_s23 = scalar_lea.hbm %s981_s2, 4096 }
  0xf4   : > { %p713_p6 = scmp.ne.s32.totalorder %s922_s5, %s712_s16  ;;  %p717_p10 = scmp.lt.s32.totalorder %s922_s5, %s981_s2 }
  0xf5   : > { %p718_p11 = scmp.lt.s32.totalorder %s716_s23, %s712_s16 }
  0xf6   : > { %p714_p7 = pnand %p713_p6, %p834_p4 }
  0xf7   : > { %p719_p12 = por %p718_p11, %p717_p10 }
  0xf8   : > { %p715_p9 = pneg %p714_p7 }
  0xfa   : > { %p720_p13 = pnand %p719_p12, %p715_p9 }
  0xfc   : > { %723 = shalt.err (!%p720_p13)
}
  0xfd   : > { %s777_s26 = smov 128   ;;  %s778_s27 = smov 8  }
  0xfe   : > { %629 = dma.vmem_to_hbm [thread:$0]  (%p834_p4), %s924_s30, 2048, %s922_s5, %s934_s12, %s777_s26, %s777_s26, %s778_s27  }
  0xff PF: > { %p635_p0 = scmp.ge.s32.totalorder %s774_s14, 2  ;;  %s472_s28 = sand.u32 1, %s754_s9  }
 0x100   : > { %s473_s29 = scalar_lea.sflag [#allocation3], %s472_s28 }
 0x101   : > { %p632_p1 = pnand %p635_p0, %p841_p8 }
 0x103   : > { %p633_p2 = pneg %p632_p1 }
 0x105   : > { %749 = dma.done.wait (%p633_p2), %s473_s29, 2048  }
 0x106   : > { %751 = vsyncadd (%p633_p2), %s473_s29, 4294965248  ;;  %s15_s14 = sadd.s32 1, %s774_s14   ;;  %s984_s9 = smov %s758_s10 }
 0x107   : > { %p12_p3 = scmp.ge.s32.totalorder %s15_s14, 4   ;;  %s985_s10 = smov %s762_s11 }
 0x108   : > { %s986_s11 = smov %s847_s22  ;;  %s987_s12 = smov %s770_s13 }
 0x109   : > { %s988_s13 = smov %s990_s17  ;;  %14 = sbr.rel (!%p12_p3) target bundleno = 4 (0x4), region = 68 }
 0x10e   :  { %478 = vsyncpa [#allocation3], 1 }
 0x10f   :  { %480 = vsyncpa [#allocation3 + $0x1], 1 }

</bundles_post_ra>
